<compile_context>
chip_gen: v7x
topology: tpu7x:2x2x1
jax: 0.10.0
libtpu: 0.0.40
codegen_flags: <defaults>
</compile_context>

<pallas_src>
import math

import jax
import jax.numpy as jnp
from jax import lax
from jax.experimental import pallas as pl
from jax.experimental.pallas import tpu as pltpu

_INV_SQRT2 = 1.0 / math.sqrt(2.0)


def _round_up(x, m):
    return ((x + m - 1) // m) * m


def _default_row_tile():
    """512 rows on 128-MiB-VMEM parts (v5e/v6e), 256 on v7x (64 MiB / TC)."""
    try:
        info = pltpu.get_tpu_info()
        vmem = getattr(info, "vmem_capacity_bytes", 0)
    except Exception:
        return 256
    return 512 if vmem >= (100 << 20) else 256


def _mrc_kernel(x_ref, w1_ref, b1_ref, w2_ref, b2_ref, o_ref, h_ref):
    """Row tile of Linear -> GELU(erf) -> LayerNorm, then one label-col tile."""
    # Stage 1 runs once per row tile (first column iteration) and caches the
    # normalized hidden activations in VMEM scratch for all column tiles.
    @pl.when(pl.program_id(1) == 0)
    def _():
        h = jnp.dot(x_ref[...], w1_ref[...],
                    preferred_element_type=jnp.float32)          # f32 accum
        h = h + b1_ref[...].astype(jnp.float32)
        # GELU, exact erf form (matches BERT-style GELU in the reference).
        h = 0.5 * h * (1.0 + lax.erf(h * _INV_SQRT2))
        # LayerNorm statistics in f32, eps=1e-12 (gamma/beta folded into w2/b2).
        mean = jnp.mean(h, axis=-1, keepdims=True)
        var = jnp.mean(jnp.square(h - mean), axis=-1, keepdims=True)
        h = (h - mean) * lax.rsqrt(var + 1e-12)
        h_ref[...] = h.astype(h_ref.dtype)

    # Stage 2: one lane-dense column tile of the classification Linear.
    out = jnp.dot(h_ref[...], w2_ref[...], preferred_element_type=jnp.float32)
    out = out + b2_ref[...].astype(jnp.float32)
    o_ref[...] = out.astype(o_ref.dtype)


def region_classification(x, params, *, row_tile=None, col_tile=None):
    """Apply the MRC head to x of shape (..., H). Returns (..., L)."""
    w1, b1 = params["w1"], params["b1"]
    gamma, beta = params["gamma"], params["beta"]
    w2, b2 = params["w2"], params["b2"]

    H = w1.shape[0]
    L = w2.shape[1]
    lead = x.shape[:-1]
    x2 = x.reshape(-1, H)
    N = x2.shape[0]

    # --- Fold LayerNorm affine into the second Linear (one-time, in f32). ---
    #   (h*gamma + beta) @ w2 + b2 == h @ (gamma[:,None]*w2) + (beta@w2 + b2)
    w2_f32 = w2.astype(jnp.float32)
    w2f = (gamma.astype(jnp.float32)[:, None] * w2_f32).astype(w2.dtype)
    b2f = b2.astype(jnp.float32) + beta.astype(jnp.float32) @ w2_f32   # (L,)

    # --- Row tiling: fixed tile, pad N instead of asserting divisibility. ---
    if row_tile is None:
        row_tile = _default_row_tile()
    row_tile = _round_up(max(8, min(int(row_tile), _round_up(N, 8))), 8)
    Np = _round_up(N, row_tile)
    if Np != N:
        x2 = jnp.pad(x2, ((0, Np - N), (0, 0)))

    # --- Label tiling: pad L to a lane-dense multiple of 128, tile if big. ---
    if col_tile is None:
        col_tile = min(512, _round_up(L, 128))
    col_tile = _round_up(int(col_tile), 128)
    Lp = _round_up(L, col_tile)
    if Lp != L:
        w2f = jnp.pad(w2f, ((0, 0), (0, Lp - L)))
        b2f = jnp.pad(b2f, ((0, Lp - L),))
    b1r = b1.reshape(1, H)
    b2r = b2f.reshape(1, Lp)

    grid = (Np // row_tile, Lp // col_tile)

    # --- Explicit VMEM budget: double-buffered tiles + f32 intermediates. ---
    xb = jnp.dtype(x2.dtype).itemsize
    wb = jnp.dtype(w1.dtype).itemsize
    ob = jnp.dtype(x.dtype).itemsize
    est = (2 * row_tile * H * xb                     # x tile (double buffered)
           + 2 * (H * H + H) * wb                    # w1, b1
           + 2 * (H + 1) * col_tile * max(wb, 4)     # w2, b2 column tiles
           + 2 * row_tile * col_tile * ob            # output tile
           + row_tile * H * jnp.dtype(w2f.dtype).itemsize   # LN scratch
           + 6 * row_tile * H * 4)                   # f32 intermediates
    vmem_limit = int(min(max(est * 3 // 2, 32 * 1024 * 1024),
                         48 * 1024 * 1024))

    out_padded = pl.pallas_call(
        _mrc_kernel,
        out_shape=jax.ShapeDtypeStruct((Np, Lp), x.dtype),
        grid_spec=pltpu.PrefetchScalarGridSpec(
            num_scalar_prefetch=0,
            grid=grid,
            in_specs=[
                pl.BlockSpec((row_tile, H), lambda i, j: (i, 0)),   # x rows
                pl.BlockSpec((H, H), lambda i, j: (0, 0)),          # w1
                pl.BlockSpec((1, H), lambda i, j: (0, 0)),          # b1
                pl.BlockSpec((H, col_tile), lambda i, j: (0, j)),   # w2 (folded)
                pl.BlockSpec((1, col_tile), lambda i, j: (0, j)),   # b2 (folded)
            ],
            out_specs=pl.BlockSpec((row_tile, col_tile), lambda i, j: (i, j)),
            scratch_shapes=[pltpu.VMEM((row_tile, H), w2f.dtype)],
        ),
        compiler_params=pltpu.CompilerParams(
            dimension_semantics=("parallel", "arbitrary"),
            vmem_limit_bytes=vmem_limit,
        ),
    )(x2, w1, b1r, w2f, b2r)

    return out_padded[:N, :L].reshape(*lead, L)


def init_params(key, hidden_size, label_dim, dtype=jnp.float32):
    """Deterministic synthetic parameters (same shapes as the PyTorch module)."""
    k1, k2, k3, k4, k5, k6 = jax.random.split(key, 6)
    s1 = 1.0 / math.sqrt(hidden_size)
    return {
        # stored already transposed to (in, out) so the kernel does x @ W
        "w1": jax.random.uniform(k1, (hidden_size, hidden_size), dtype,
                                 minval=-s1, maxval=s1),
        "b1": jax.random.uniform(k2, (hidden_size,), dtype,
                                 minval=-s1, maxval=s1),
        # LayerNorm affine; randomized (rather than ones/zeros) so the
        # gamma/beta -> w2/b2 fold is actually exercised by the check.
        "gamma": (1.0 + 0.1 * jax.random.normal(k5, (hidden_size,))).astype(dtype),
        "beta": (0.1 * jax.random.normal(k6, (hidden_size,))).astype(dtype),
        "w2": jax.random.uniform(k3, (hidden_size, label_dim), dtype,
                                 minval=-s1, maxval=s1),
        "b2": jax.random.uniform(k4, (label_dim,), dtype,
                                 minval=-s1, maxval=s1),
    }


def _reference(x, params):
    """Pure-JAX reference (unfolded LayerNorm affine) for a sanity check."""
    h = x @ params["w1"] + params["b1"]
    h = 0.5 * h * (1.0 + lax.erf(h / math.sqrt(2.0)))
    mean = jnp.mean(h, axis=-1, keepdims=True)
    var = jnp.mean((h - mean) ** 2, axis=-1, keepdims=True)
    h = (h - mean) / jnp.sqrt(var + 1e-12)
    h = h * params["gamma"] + params["beta"]
    return h @ params["w2"] + params["b2"]


if __name__ == "__main__":
    key = jax.random.PRNGKey(0)

    # Check 1: module-sized toy shapes (single row/column tile).
    batch, seq, hidden, label_dim = 2, 8, 32, 8
    kx, kp, key = jax.random.split(key, 3)
    x = jax.random.normal(kx, (batch, seq, hidden), jnp.float32)
    params = init_params(kp, hidden, label_dim)

    out = region_classification(x, params)
    out = jax.block_until_ready(out)
    ref = _reference(x, params)
    assert out.shape == (batch, seq, label_dim)
    assert jnp.allclose(out, ref, atol=2e-4, rtol=2e-4), "mismatch vs reference"

    # Check 2: exercise row padding (N not a multiple of the tile), label
    # padding, and the multi-tile grid with the cached LayerNorm scratch.
    batch2, seq2, label_dim2 = 3, 5, 200
    kx2, kp2, key = jax.random.split(key, 3)
    x2 = jax.random.normal(kx2, (batch2, seq2, hidden), jnp.float32)
    params2 = init_params(kp2, hidden, label_dim2)

    out2 = region_classification(x2, params2, row_tile=8, col_tile=128)
    out2 = jax.block_until_ready(out2)
    ref2 = _reference(x2, params2)
    assert out2.shape == (batch2, seq2, label_dim2)
    assert jnp.allclose(out2, ref2, atol=2e-4, rtol=2e-4), "mismatch (tiled)"

    print("KERNEL_OK")
</pallas_src>

<mosaic_0001>
module attributes {stable_mosaic.version = 11 : i64} {
  func.func @_mrc_kernel(%arg0: i32, %arg1: i32, %arg2: memref<16x32xf32, #tpu.memory_space<vmem>>, %arg3: memref<32x32xf32, #tpu.memory_space<vmem>>, %arg4: memref<1x32xf32, #tpu.memory_space<vmem>>, %arg5: memref<32x128xf32, #tpu.memory_space<vmem>>, %arg6: memref<1x128xf32, #tpu.memory_space<vmem>>, %arg7: memref<16x128xf32, #tpu.memory_space<vmem>>, %arg8: memref<16x32xf32, #tpu.memory_space<vmem>>) attributes {dimension_semantics = [#tpu.dimension_semantics<parallel>, #tpu.dimension_semantics<arbitrary>], iteration_bounds = array<i64: 1, 1>, scalar_prefetch = 0 : i64, scratch_operands = 1 : i64, tpu.core_type = #tpu.core_type<tc>, window_params = [{transform_indices = @transform_0, window_bounds = array<i64: 16, 32>}, {pipeline_mode = #tpu.pipeline_mode<synchronous>, transform_indices = @transform_1, window_bounds = array<i64: 32, 32>}, {pipeline_mode = #tpu.pipeline_mode<synchronous>, transform_indices = @transform_2, window_bounds = array<i64: 1, 32>}, {transform_indices = @transform_3, window_bounds = array<i64: 32, 128>}, {transform_indices = @transform_4, window_bounds = array<i64: 1, 128>}, {transform_indices = @transform_5, window_bounds = array<i64: 16, 128>}]} {
    %c0_i32 = arith.constant 0 : i32
    %0 = arith.cmpi eq, %arg1, %c0_i32 : i32
    %1 = arith.extui %0 : i1 to i32
    %c0_i32_0 = arith.constant 0 : i32
    %2 = arith.cmpi ne, %1, %c0_i32_0 : i32
    scf.if %2 {
      %c0_8 = arith.constant 0 : index
      %c0_9 = arith.constant 0 : index
      %10 = vector.load %arg2[%c0_8, %c0_9] : memref<16x32xf32, #tpu.memory_space<vmem>>, vector<16x32xf32>
      %c0_10 = arith.constant 0 : index
      %c0_11 = arith.constant 0 : index
      %11 = vector.load %arg3[%c0_10, %c0_11] : memref<32x32xf32, #tpu.memory_space<vmem>>, vector<32x32xf32>
      %cst_12 = arith.constant dense<0.000000e+00> : vector<16x32xf32>
      %12 = tpu.matmul %10, %11, %cst_12 {dimension_numbers = #tpu.dot_dimension_numbers<[1], [0], [0], [1], [0, 0, 1, 1], [], []>} : vector<16x32xf32>, vector<32x32xf32>, vector<16x32xf32> -> vector<16x32xf32>
      %c0_13 = arith.constant 0 : index
      %c0_14 = arith.constant 0 : index
      %13 = vector.load %arg4[%c0_13, %c0_14] : memref<1x32xf32, #tpu.memory_space<vmem>>, vector<1x32xf32>
      %14 = vector.broadcast %13 : vector<1x32xf32> to vector<16x32xf32>
      %15 = arith.addf %12, %14 : vector<16x32xf32>
      %cst_15 = arith.constant 5.000000e-01 : f32
      %16 = vector.broadcast %cst_15 : f32 to vector<16x32xf32>
      %17 = arith.mulf %16, %15 : vector<16x32xf32>
      %cst_16 = arith.constant 0.707106769 : f32
      %18 = vector.broadcast %cst_16 : f32 to vector<16x32xf32>
      %19 = arith.mulf %15, %18 : vector<16x32xf32>
      %20 = math.erf %19 : vector<16x32xf32>
      %cst_17 = arith.constant 1.000000e+00 : f32
      %21 = vector.broadcast %cst_17 : f32 to vector<16x32xf32>
      %22 = arith.addf %21, %20 : vector<16x32xf32>
      %23 = arith.mulf %17, %22 : vector<16x32xf32>
      %cst_18 = arith.constant dense<0.000000e+00> : vector<16xf32>
      %24 = vector.multi_reduction <add>, %23, %cst_18 [1] : vector<16x32xf32> to vector<16xf32>
      %25 = vector.shape_cast %24 : vector<16xf32> to vector<16x1xf32>
      %cst_19 = arith.constant 3.200000e+01 : f32
      %26 = vector.broadcast %cst_19 : f32 to vector<16x1xf32>
      %27 = arith.divf %25, %26 : vector<16x1xf32>
      %28 = vector.broadcast %27 : vector<16x1xf32> to vector<16x32xf32>
      %29 = arith.subf %23, %28 : vector<16x32xf32>
      %30 = arith.mulf %29, %29 : vector<16x32xf32>
      %cst_20 = arith.constant dense<0.000000e+00> : vector<16xf32>
      %31 = vector.multi_reduction <add>, %30, %cst_20 [1] : vector<16x32xf32> to vector<16xf32>
      %32 = vector.shape_cast %31 : vector<16xf32> to vector<16x1xf32>
      %cst_21 = arith.constant 3.200000e+01 : f32
      %33 = vector.broadcast %cst_21 : f32 to vector<16x1xf32>
      %34 = arith.divf %32, %33 : vector<16x1xf32>
      %35 = vector.broadcast %27 : vector<16x1xf32> to vector<16x32xf32>
      %36 = arith.subf %23, %35 : vector<16x32xf32>
      %cst_22 = arith.constant 9.99999996E-13 : f32
      %37 = vector.broadcast %cst_22 : f32 to vector<16x1xf32>
      %38 = arith.addf %34, %37 : vector<16x1xf32>
      %39 = math.rsqrt %38 : vector<16x1xf32>
      %40 = vector.broadcast %39 : vector<16x1xf32> to vector<16x32xf32>
      %41 = arith.mulf %36, %40 : vector<16x32xf32>
      %c0_23 = arith.constant 0 : index
      %c0_24 = arith.constant 0 : index
      %42 = vector.load %arg8[%c0_23, %c0_24] : memref<16x32xf32, #tpu.memory_space<vmem>>, vector<16x32xf32>
      tpu.vector_store %arg8[%c0_23, %c0_24], %41 {strides = array<i32>} : memref<16x32xf32, #tpu.memory_space<vmem>>, vector<16x32xf32>,
    } else {
    }
    %c0 = arith.constant 0 : index
    %c0_1 = arith.constant 0 : index
    %3 = vector.load %arg8[%c0, %c0_1] : memref<16x32xf32, #tpu.memory_space<vmem>>, vector<16x32xf32>
    %c0_2 = arith.constant 0 : index
    %c0_3 = arith.constant 0 : index
    %4 = vector.load %arg5[%c0_2, %c0_3] : memref<32x128xf32, #tpu.memory_space<vmem>>, vector<32x128xf32>
    %cst = arith.constant dense<0.000000e+00> : vector<16x128xf32>
    %5 = tpu.matmul %3, %4, %cst {dimension_numbers = #tpu.dot_dimension_numbers<[1], [0], [0], [1], [0, 0, 1, 1], [], []>} : vector<16x32xf32>, vector<32x128xf32>, vector<16x128xf32> -> vector<16x128xf32>
    %c0_4 = arith.constant 0 : index
    %c0_5 = arith.constant 0 : index
    %6 = vector.load %arg6[%c0_4, %c0_5] : memref<1x128xf32, #tpu.memory_space<vmem>>, vector<1x128xf32>
    %7 = vector.broadcast %6 : vector<1x128xf32> to vector<16x128xf32>
    %8 = arith.addf %5, %7 : vector<16x128xf32>
    %c0_6 = arith.constant 0 : index
    %c0_7 = arith.constant 0 : index
    %9 = vector.load %arg7[%c0_6, %c0_7] : memref<16x128xf32, #tpu.memory_space<vmem>>, vector<16x128xf32>
    tpu.vector_store %arg7[%c0_6, %c0_7], %8 {strides = array<i32>} : memref<16x128xf32, #tpu.memory_space<vmem>>, vector<16x128xf32>,
    return
  }
  func.func @transform_0(%arg0: i32, %arg1: i32) -> (i32, i32) {
    %c0_i32 = arith.constant 0 : i32
    %c0_i32_0 = arith.constant 0 : i32
    return %arg0, %c0_i32 : i32, i32
  }
  func.func @transform_1(%arg0: i32, %arg1: i32) -> (i32, i32) {
    %c0_i32 = arith.constant 0 : i32
    %c0_i32_0 = arith.constant 0 : i32
    %c0_i32_1 = arith.constant 0 : i32
    return %c0_i32, %c0_i32_0 : i32, i32
  }
  func.func @transform_2(%arg0: i32, %arg1: i32) -> (i32, i32) {
    %c0_i32 = arith.constant 0 : i32
    %c0_i32_0 = arith.constant 0 : i32
    %c0_i32_1 = arith.constant 0 : i32
    return %c0_i32, %c0_i32_0 : i32, i32
  }
  func.func @transform_3(%arg0: i32, %arg1: i32) -> (i32, i32) {
    %c0_i32 = arith.constant 0 : i32
    %c0_i32_0 = arith.constant 0 : i32
    return %c0_i32, %arg1 : i32, i32
  }
  func.func @transform_4(%arg0: i32, %arg1: i32) -> (i32, i32) {
    %c0_i32 = arith.constant 0 : i32
    %c0_i32_0 = arith.constant 0 : i32
    return %c0_i32, %arg1 : i32, i32
  }
  func.func @transform_5(%arg0: i32, %arg1: i32) -> (i32, i32) {
    %c0_i32 = arith.constant 0 : i32
    return %arg0, %arg1 : i32, i32
  }
}

</mosaic_0001>

<bundles_post_ra>
// kernel: tpu_custom_call.1
= control target key start
LH: loop header
LB: loop body
LE: loop exit
PB: predicated region body
PF: predicated region fallthrough
CT: control target
= control target key end

     0   :  { %10 = vsyncpa [#allocation4], 0  ;;  %s598_s0 = inlined_call_operand.hbm [shape: f32[16,32], index: 0, kind: input, shape index: {}]   ;;  %s599_s1 = inlined_call_operand.hbm [shape: f32[32,32], index: 1, kind: input, shape index: {}]   ;;  %s600_s2 = inlined_call_operand.vmem [shape: f32[1,32], index: 2, kind: input, shape index: {}]   ;;  %s601_s3 = inlined_call_operand.hbm [shape: f32[32,128], index: 3, kind: input, shape index: {}]   ;;  %s602_s4 = inlined_call_operand.vmem [shape: f32[1,128], index: 4, kind: input, shape index: {}]   ;;  %s603_s5 = inlined_call_operand.hbm [shape: f32[16,128], index: 5, kind: output, shape index: {}]  }
   0x1   :  { %11 = vsyncpa [#allocation7], 0 }
   0x2   :  { %12 = vsyncpa [#allocation5], 0  ;;  %s479_s18 = smov [#allocation6]   ;;  %s480_s20 = smov [#allocation3]  }
   0x3   :  { %s30_s19 = sshll.u32 %s479_s18, 4  ;;  %s18_s21 = sshll.u32 %s480_s20, 4  ;;  %s31_s19 = int_to_ptr.vmem [resolvable:$true] %s30_s19  ;;  %s515_s21 = int_to_ptr.vmem [resolvable:$true] %s18_s21 }
   0x4   :  { %s385_s24 = scalar_lea.hbm %s599_s1, 512 }
   0x5   :  { %p386_p0 = scmp.ne.s32.totalorder %s599_s1, %s385_s24  ;;  %p389_p1 = scmp.lt.u32.totalorder %s385_s24, %s599_s1 }
   0x7   :  { %p391_p2 = pnand %p389_p1, %p386_p0 }
   0x9   :  { %394 = shalt.err (!%p391_p2)
}
   0xa   :  { %s395_s29 = scalar_lea.vmem %s31_s19, 512  ;;  %p400_p4 = scmp.lt.s32.totalorder %s31_s19, %s31_s19 }
   0xb   :  { %p396_p3 = scmp.ne.s32.totalorder %s31_s19, %s395_s29  ;;  %p401_p5 = scmp.lt.s32.totalorder %s395_s29, %s395_s29 }
   0xd   :  { %p402_p6 = por %p401_p5, %p400_p4 }
   0xf   :  { %p403_p7 = pnand %p402_p6, %p396_p3 }
  0x11   :  { %406 = shalt.err (!%p403_p7)
}
  0x12   :  { %s481_s30 = smov 128   ;;  %s482_s6 = smov 8  }
  0x13   :  { %36 = dma.hbm_to_vmem [thread:$0]  %s599_s1, 512, %s31_s19, [#allocation7], %s481_s30, %s481_s30, %s482_s6  }
  0x14   :  { %s407_s11 = scalar_lea.hbm %s598_s0, 256 }
  0x15   :  { %p408_p8 = scmp.ne.s32.totalorder %s598_s0, %s407_s11  ;;  %p411_p9 = scmp.lt.u32.totalorder %s407_s11, %s598_s0 }
  0x17   :  { %p413_p10 = pnand %p411_p9, %p408_p8 }
  0x19   :  { %416 = shalt.err (!%p413_p10)
}
  0x1a   :  { %s417_s16 = scalar_lea.vmem %s515_s21, 256  ;;  %p422_p12 = scmp.lt.s32.totalorder %s515_s21, %s515_s21 }
  0x1b   :  { %p418_p11 = scmp.ne.s32.totalorder %s515_s21, %s417_s16  ;;  %p423_p13 = scmp.lt.s32.totalorder %s417_s16, %s417_s16 }
  0x1d   :  { %p424_p0 = por %p423_p13, %p422_p12 }
  0x1f   :  { %p425_p1 = pnand %p424_p0, %p418_p11 }
  0x21   :  { %428 = shalt.err (!%p425_p1)
}
  0x22   :  { %24 = dma.hbm_to_vmem [thread:$0]  %s598_s0, 256, %s515_s21, [#allocation4], %s481_s30, %s481_s30, %s482_s6  }
  0x23   :  { %s483_s18 = smov [#allocation8]   ;;  %s429_s23 = scalar_lea.hbm %s601_s3, 512 }
  0x24   :  { %s44_s19 = sshll.u32 %s483_s18, 4  ;;  %p430_p2 = scmp.ne.s32.totalorder %s601_s3, %s429_s23  ;;  %s45_s19 = int_to_ptr.vmem [resolvable:$true] %s44_s19 }
  0x25   :  { %p433_p3 = scmp.lt.u32.totalorder %s429_s23, %s601_s3 }
  0x27   :  { %p435_p4 = pnand %p433_p3, %p430_p2 }
  0x29   :  { %438 = shalt.err (!%p435_p4)
}
  0x2a   :  { %s439_s28 = scalar_lea.vmem %s45_s19, 512  ;;  %p444_p6 = scmp.lt.s32.totalorder %s45_s19, %s45_s19 }
  0x2b   :  { %p440_p5 = scmp.ne.s32.totalorder %s45_s19, %s439_s28  ;;  %p445_p7 = scmp.lt.s32.totalorder %s439_s28, %s439_s28 }
  0x2d   :  { %p446_p8 = por %p445_p7, %p444_p6 }
  0x2f   :  { %p447_p9 = pnand %p446_p8, %p440_p5 }
  0x31   :  { %450 = shalt.err (!%p447_p9)
}
  0x32   :  { %50 = dma.hbm_to_vmem [thread:$0]  %s601_s3, 512, %s45_s19, [#allocation7], %s481_s30, %s481_s30, %s482_s6  }
  0x33   :  { %473 = dma.done.wait [#allocation4], 256  }
  0x34   :  { %474 = vsyncadd [#allocation4], 4294967040 }
  0x35   :  { %475 = dma.done.wait [#allocation7], 1024  }
  0x36   :  { %476 = vsyncadd [#allocation7], 4294966272  ;;  %vm79_vm0 = vcmask 261120   ;;  %v68_v0 = vld [vmem:[#allocation6] sm:$0xff]  ;;  %v69_v1 = vld [vmem:[#allocation6 + $0x8] sm:$0xff]  ;;  %s484_s8 = smov [#allocation9]  }
  0x37   :  { %v70_v2 = vld [vmem:[#allocation6 + $0x10] sm:$0xff]  ;;  %v355_v3 = vpack.c.bf16 %v69_v1, %v68_v0  ;;  %v71_v4 = vld [vmem:[#allocation6 + $0x18] sm:$0xff]  ;;  %v315_v8 = vld [vmem:[%s600_s2] ss:$0 sm:$0xff]  ;;  %s302_s9 = sshll.u32 %s484_s8, 4  ;;  %s303_s9 = int_to_ptr.vmem [resolvable:$true] %s302_s9 }
  0x38   :  { %v66_v5 = vld [vmem:[#allocation3] sm:$0xff]  ;;  %v359_v6 = vpack.c.bf16 %v71_v4, %v70_v2  ;;  %v67_v7 = vld [vmem:[#allocation3 + $0x8] sm:$0xff]  ;;  %v202_v35 = vld [vmem:[#allocation8] sm:$0xff]  ;;  %s451_s10 = scalar_lea.vmem %s303_s9, 256  ;;  %p456_p11 = scmp.lt.s32.totalorder %s303_s9, %s303_s9 }
  0x39   :  { %341 = vmatprep.mubr.msk.f32.mxu0 %vm79_vm0, %v66_v5  ;;  %356 = vmatprep.subr.bf16.mxu0 %v355_v3  ;;  %v203_v36 = vld [vmem:[#allocation8 + $0x8] sm:$0xff]  ;;  %v204_v38 = vld [vmem:[#allocation8 + $0x10] sm:$0xff]  ;;  %v205_v39 = vld [vmem:[#allocation8 + $0x18] sm:$0xff]  ;;  %p452_p10 = scmp.ne.s32.totalorder %s303_s9, %s451_s10  ;;  %p457_p12 = scmp.lt.s32.totalorder %s451_s10, %s451_s10 }
  0x3a   :  { %358 = vmatpush3.bf16.msra.mxu0 %v355_v3  ;;  %v363_v37 = vpack.c.bf16 %v203_v36, %v202_v35  ;;  %v367_v40 = vpack.c.bf16 %v205_v39, %v204_v38  ;;  %v318_v53 = vld [vmem:[%s602_s4] ss:$0 sm:$0xff] }
  0x3b   :  { %360 = vmatprep.subr.bf16.mxu0 %v359_v6  ;;  %p458_p13 = por %p457_p12, %p456_p11 }
  0x3c   :  { %364 = vmatprep.subr.bf16.mxu1 %v363_v37 }
  0x3d   :  { %366 = vmatpush3.bf16.msra.mxu1 %v363_v37  ;;  %p459_p0 = pnand %p458_p13, %p452_p10 }
  0x3e   :  { %362 = vmatpush3.bf16.msra.mxu0 %v359_v6  ;;  %368 = vmatprep.subr.bf16.mxu1 %v367_v40 }
  0x41   :  { %342 = vmatmul.mubr.msk.f32.vlgmr.msra.gmra.mrb[0].mxu0 %vm79_vm0, %v67_v7  ;;  %370 = vmatpush3.bf16.msra.mxu1 %v367_v40 }
 0x114   :  { %v343_v9 = vpop.f32.mrb[0].mxu0 }
 0x115   :  { %v158_v10 = vadd.f32 %v343_v9, %v315_v8  ;;  %v152_v11 = vpop.f32.mrb[1].mxu0 }
 0x116   :  { %v153_v12 = vadd.f32 %v315_v8, %v152_v11 }
 0x117   :  { %v164_v13 = vmul.f32 0.70710677, %v158_v10  ;;  %v162_v20 = vmul.f32 0.5, %v158_v10 }
 0x118   :  { %v163_v14 = vmul.f32 0.70710677, %v153_v12  ;;  %v161_v17 = vmul.f32 0.5, %v153_v12 }
 0x119   :  { %377 = verf.f32 %v164_v13 }
 0x11a   :  { %379 = verf.f32 %v163_v14 }
 0x123   :  { %v378_v15 = vpop.eup %377 }
 0x124   :  { %v380_v16 = vpop.eup %379  ;;  %v168_v19 = vadd.f32 1.0, %v378_v15 }
 0x125   :  { %v167_v18 = vadd.f32 1.0, %v380_v16 }
 0x126   :  { %v170_v23 = vmul.f32 %v168_v19, %v162_v20 }
 0x127   :  { %v169_v21 = vmul.f32 %v167_v18, %v161_v17 }
 0x128   :  { %v174_v24 = vsel %vm79_vm0, %v170_v23, 0.0 }
 0x129   :  { %v171_v22 = vsel %vm79_vm0, %v169_v21, 0.0 }
 0x12a   :  { %172 = vadd.xlane.f32.xlu0 %v171_v22 }
 0x12e   :  { %175 = vadd.xlane.f32.xlu0 %v174_v24 }
 0x1b7   :  { %v173_v25 = vpop.xlane.xlu0 %172 }
 0x1b8   :  { %v178_v26 = vmul.f32 0.03125, %v173_v25 }
 0x1ba   :  { %v180_v27 = vsub.f32 %v169_v21, %v178_v26 }
 0x1bb   :  { %v176_v28 = vpop.xlane.xlu0 %175 }
 0x1bc   :  { %v179_v29 = vmul.f32 0.03125, %v176_v28  ;;  %v182_v30 = vmul.f32 %v180_v27, %v180_v27 }
 0x1be   :  { %v181_v31 = vsub.f32 %v170_v23, %v179_v29  ;;  %v184_v32 = vsel %vm79_vm0, %v182_v30, 0.0 }
 0x1bf   :  { %185 = vadd.xlane.f32.xlu1 %v184_v32 }
 0x1c0   :  { %v183_v33 = vmul.f32 %v181_v31, %v181_v31 }
 0x1c2   :  { %v187_v34 = vsel %vm79_vm0, %v183_v33, 0.0 }
 0x1c3   :  { %188 = vadd.xlane.f32.xlu1 %v187_v34 }
 0x24c   :  { %v186_v41 = vpop.xlane.xlu1 %185 }
 0x24d   :  { %v190_v42 = vmul.f32 0.03125, %v186_v41 }
 0x24f   :  { %v192_v43 = vadd.f32 1e-12, %v190_v42 }
 0x250   :  { %v189_v44 = vpop.xlane.xlu1 %188 }
 0x251   :  { %381 = vrsqrt.f32 %v192_v43  ;;  %v191_v45 = vmul.f32 0.03125, %v189_v44 }
 0x253   :  { %v193_v46 = vadd.f32 1e-12, %v191_v45 }
 0x255   :  { %383 = vrsqrt.f32 %v193_v46 }
 0x25b   :  { %v382_v47 = vpop.eup %381 }
 0x25c   :  { %v196_v48 = vmul.f32 %v382_v47, %v180_v27 }
 0x25e   :  { %198 = vst.msk [vmem:[#allocation2] sm:$0xff] %vm79_vm0, %v196_v48 }
 0x25f   :  { %v384_v49 = vpop.eup %383 }
 0x260   :  { %v197_v50 = vmul.f32 %v384_v49, %v181_v31 }
 0x262   :  { %199 = vst.msk [vmem:[#allocation2 + $0x8] sm:$0xff] %vm79_vm0, %v197_v50 }
 0x265   :  { %v200_v51 = vld [vmem:[#allocation2] sm:$0xff] }
 0x266   :  { %352 = vmatprep.mubr.msk.f32.mxu1 %vm79_vm0, %v200_v51 }
 0x269   :  { %v201_v52 = vld [vmem:[#allocation2 + $0x8] sm:$0xff] }
 0x26a   :  { %353 = vmatmul.mubr.msk.f32.vlgmr.msra.gmra.mrb[0].mxu1 %vm79_vm0, %v201_v52 }
 0x33d   :  { %v354_v54 = vpop.f32.mrb[0].mxu1 }
 0x33e   :  { %v292_v55 = vadd.f32 %v354_v54, %v318_v53  ;;  %v286_v56 = vpop.f32.mrb[1].mxu1 }
 0x33f   :  { %v287_v57 = vadd.f32 %v318_v53, %v286_v56 }
 0x340   :  { %296 = vst [vmem:[#allocation9 + $0x8] sm:$0xff] %v292_v55 }
 0x341   :  { %295 = vst [vmem:[#allocation9] sm:$0xff] %v287_v57 }
 0x342   :  { %462 = shalt.err (!%p459_p0)
}
 0x343   :  { %s463_s4 = scalar_lea.hbm %s603_s5, 256 }
 0x344   :  { %p464_p1 = scmp.ne.s32.totalorder %s603_s5, %s463_s4  ;;  %p467_p2 = scmp.lt.u32.totalorder %s463_s4, %s603_s5 }
 0x346   :  { %p469_p3 = pnand %p467_p2, %p464_p1 }
 0x348   :  { %472 = shalt.err (!%p469_p3)
}
 0x349   :  { %308 = dma.vmem_to_hbm [thread:$0]  %s303_s9, 256, %s603_s5, [#allocation5], %s481_s30, %s481_s30, %s482_s6  }
 0x34a   :  { %477 = dma.done.wait [#allocation5], 256  }
 0x34b   :  { %478 = vsyncadd [#allocation5], 4294967040 }
 0x34c   :  { %312 = vsyncpa [#allocation4], 1 }
 0x34d   :  { %313 = vsyncpa [#allocation7], 1 }
 0x34e   :  { %314 = vsyncpa [#allocation5], 1 }

</bundles_post_ra>
